<compile_context>
chip_gen: v5e
topology: v5e:2x2
jax: 0.10.0
libtpu: 0.0.40
codegen_flags: <defaults>
</compile_context>

<pallas_src>
import jax
import jax.numpy as jnp
from jax.experimental import pallas as pl
from jax.experimental.pallas import tpu as pltpu

_LANE = 128
_SUBLANE = 8


def _round_up(x, m):
    return (x + m - 1) // m * m


def _mlp_kernel(x_ref, w1_ref, b1_ref, w2_ref, b2_ref, o_ref):
    # hidden = relu(x @ W1 + b1) -- MXU matmul with f32 accumulation.
    h = jnp.dot(x_ref[...], w1_ref[...], preferred_element_type=jnp.float32)
    h = jnp.maximum(h + b1_ref[...], 0.0)        # bias add + ReLU in f32 (v5e-safe)
    # out = hidden @ W2 + b2 ; downcast h once only if weights are low-precision.
    y = jnp.dot(h.astype(w2_ref.dtype), w2_ref[...],
                preferred_element_type=jnp.float32)
    o_ref[...] = (y + b2_ref[...]).astype(o_ref.dtype)


def linear_qnet_forward(x, w1, b1, w2, b2, *, compute_dtype=None,
                        vmem_budget_bytes=48 << 20):
    """Fused forward pass of Linear_QNet.

    x  : [B, input_size]
    w1 : [input_size, hidden_size]   (transposed vs. PyTorch's [out, in])
    b1 : [hidden_size] or [1, hidden_size]
    w2 : [hidden_size, output_size]
    b2 : [output_size] or [1, output_size]
    returns [B, output_size]
    """
    B, in_size = x.shape
    hidden = w1.shape[1]
    out_size = w2.shape[1]

    if compute_dtype is not None:
        x = x.astype(compute_dtype)
        w1 = w1.astype(compute_dtype)
        w2 = w2.astype(compute_dtype)
    out_dtype = x.dtype

    # Biases stay f32: the bias add / ReLU run on the f32 accumulator.
    b1 = b1.astype(jnp.float32).reshape(1, hidden)
    b2 = b2.astype(jnp.float32).reshape(1, out_size)

    # Lane-dense output: pad output columns up to 128 (full-width stores,
    # contiguous output DMA, full MXU N). Sliced back at the end.
    out_p = _round_up(out_size, _LANE)
    if out_p != out_size:
        w2 = jnp.pad(w2, ((0, 0), (0, out_p - out_size)))
        b2 = jnp.pad(b2, ((0, 0), (0, out_p - out_size)))

    # Derive the batch tile TB from a per-generation-safe VMEM budget
    # (double-buffered x/out tiles + resident weights must fit).
    x_bytes = jnp.dtype(x.dtype).itemsize
    o_bytes = jnp.dtype(out_dtype).itemsize
    per_row = 2 * (in_size * x_bytes + out_p * o_bytes)          # 2x = double buffer
    weight_bytes = (w1.size * jnp.dtype(w1.dtype).itemsize
                    + w2.size * jnp.dtype(w2.dtype).itemsize
                    + b1.size * 4 + b2.size * 4)
    tile_budget = max(vmem_budget_bytes // 2 - weight_bytes, per_row * _SUBLANE)
    tb_max = max(int(tile_budget // per_row), _SUBLANE)
    TB = min(512, _round_up(B, _SUBLANE), tb_max)
    TB = max(_SUBLANE, (TB // _SUBLANE) * _SUBLANE)

    # Pad batch to a multiple of TB so the trailing tile is never partial.
    B_p = _round_up(B, TB)
    if B_p != B:
        x = jnp.pad(x, ((0, B_p - B), (0, 0)))
    grid = (B_p // TB,)

    flops = 2 * B_p * (in_size * hidden + hidden * out_p)
    bytes_accessed = (B_p * in_size * x_bytes + weight_bytes
                      + B_p * out_p * o_bytes)

    out = pl.pallas_call(
        _mlp_kernel,
        out_shape=jax.ShapeDtypeStruct((B_p, out_p), out_dtype),
        grid_spec=pltpu.PrefetchScalarGridSpec(
            num_scalar_prefetch=0,
            grid=grid,
            in_specs=[
                pl.BlockSpec((TB, in_size), lambda i: (i, 0)),      # streamed x tile
                pl.BlockSpec((in_size, hidden), lambda i: (0, 0)),  # resident W1
                pl.BlockSpec((1, hidden), lambda i: (0, 0)),        # resident b1
                pl.BlockSpec((hidden, out_p), lambda i: (0, 0)),    # resident W2
                pl.BlockSpec((1, out_p), lambda i: (0, 0)),         # resident b2
            ],
            out_specs=pl.BlockSpec((TB, out_p), lambda i: (i, 0)),
        ),
        compiler_params=pltpu.CompilerParams(
            dimension_semantics=("parallel",),      # shard batch across TCs (v7x)
            vmem_limit_bytes=vmem_budget_bytes,
        ),
        cost_estimate=pl.CostEstimate(
            flops=flops, transcendentals=0, bytes_accessed=bytes_accessed),
    )(x, w1, b1, w2, b2)

    return out[:B, :out_size]


def init_params(key, input_size, hidden_size, output_size, dtype=jnp.float32):
    """Deterministic init mimicking PyTorch nn.Linear defaults
    (uniform(-1/sqrt(fan_in), 1/sqrt(fan_in)))."""
    k1, k2, k3, k4 = jax.random.split(key, 4)
    bound1 = 1.0 / jnp.sqrt(input_size)
    bound2 = 1.0 / jnp.sqrt(hidden_size)
    # stored as [in, out] (already transposed for x @ W)
    w1 = jax.random.uniform(k1, (input_size, hidden_size), dtype, -bound1, bound1)
    b1 = jax.random.uniform(k2, (1, hidden_size), dtype, -bound1, bound1)
    w2 = jax.random.uniform(k3, (hidden_size, output_size), dtype, -bound2, bound2)
    b2 = jax.random.uniform(k4, (1, output_size), dtype, -bound2, bound2)
    return w1, b1, w2, b2


def reference_forward(x, w1, b1, w2, b2):
    h = jnp.maximum(x @ w1 + b1, 0.0)
    return h @ w2 + b2


# TODO(synk): Linear_QNet.save() (torch.save of the state_dict) is host-side
# file I/O with no Pallas equivalent; persistence is left to the caller.

if __name__ == "__main__":
    # Small shapes consistent with the snake-game Q-net style module.
    batch, input_size, hidden_size, output_size = 8, 16, 32, 4

    key = jax.random.PRNGKey(0)
    kx, kp = jax.random.split(key)
    x = jax.random.normal(kx, (batch, input_size), jnp.float32)
    w1, b1, w2, b2 = init_params(kp, input_size, hidden_size, output_size)

    # f32 path, tiny batch (single tile).
    out = jax.block_until_ready(linear_qnet_forward(x, w1, b1, w2, b2))
    ref = reference_forward(x, w1, b1, w2, b2)
    assert out.shape == (batch, output_size)
    assert jnp.allclose(out, ref, atol=1e-5, rtol=1e-5), "f32 mismatch vs reference"

    # Larger, non-multiple batch: exercises the pipelined batch grid + padding.
    big_B = 1000
    xb = jax.random.normal(jax.random.PRNGKey(1), (big_B, input_size), jnp.float32)
    out_big = jax.block_until_ready(linear_qnet_forward(xb, w1, b1, w2, b2))
    ref_big = reference_forward(xb, w1, b1, w2, b2)
    assert out_big.shape == (big_B, output_size)
    assert jnp.allclose(out_big, ref_big, atol=1e-5, rtol=1e-5), "gridded f32 mismatch"

    # bf16 streaming path (v6e/v7x bandwidth lever) -- looser tolerance expected.
    out_bf16 = jax.block_until_ready(
        linear_qnet_forward(xb, w1, b1, w2, b2, compute_dtype=jnp.bfloat16))
    assert jnp.allclose(out_bf16.astype(jnp.float32), ref_big,
                        atol=5e-2, rtol=5e-2), "bf16 mismatch vs reference"

    print("KERNEL_OK")
</pallas_src>

<mosaic_0001>
module attributes {stable_mosaic.version = 11 : i64} {
  func.func @_mlp_kernel(%arg0: i32, %arg1: memref<8x16xf32, #tpu.memory_space<vmem>>, %arg2: memref<16x32xf32, #tpu.memory_space<vmem>>, %arg3: memref<1x32xf32, #tpu.memory_space<vmem>>, %arg4: memref<32x128xf32, #tpu.memory_space<vmem>>, %arg5: memref<1x128xf32, #tpu.memory_space<vmem>>, %arg6: memref<8x128xf32, #tpu.memory_space<vmem>>) attributes {dimension_semantics = [#tpu.dimension_semantics<parallel>], iteration_bounds = array<i64: 1>, scalar_prefetch = 0 : i64, scratch_operands = 0 : i64, tpu.core_type = #tpu.core_type<tc>, window_params = [{transform_indices = @transform_0, window_bounds = array<i64: 8, 16>}, {pipeline_mode = #tpu.pipeline_mode<synchronous>, transform_indices = @transform_1, window_bounds = array<i64: 16, 32>}, {pipeline_mode = #tpu.pipeline_mode<synchronous>, transform_indices = @transform_2, window_bounds = array<i64: 1, 32>}, {pipeline_mode = #tpu.pipeline_mode<synchronous>, transform_indices = @transform_3, window_bounds = array<i64: 32, 128>}, {pipeline_mode = #tpu.pipeline_mode<synchronous>, transform_indices = @transform_4, window_bounds = array<i64: 1, 128>}, {transform_indices = @transform_5, window_bounds = array<i64: 8, 128>}]} {
    %c0 = arith.constant 0 : index
    %c0_0 = arith.constant 0 : index
    %0 = vector.load %arg1[%c0, %c0_0] : memref<8x16xf32, #tpu.memory_space<vmem>>, vector<8x16xf32>
    %c0_1 = arith.constant 0 : index
    %c0_2 = arith.constant 0 : index
    %1 = vector.load %arg2[%c0_1, %c0_2] : memref<16x32xf32, #tpu.memory_space<vmem>>, vector<16x32xf32>
    %cst = arith.constant dense<0.000000e+00> : vector<8x32xf32>
    %2 = tpu.matmul %0, %1, %cst {dimension_numbers = #tpu.dot_dimension_numbers<[1], [0], [0], [1], [0, 0, 1, 1], [], []>} : vector<8x16xf32>, vector<16x32xf32>, vector<8x32xf32> -> vector<8x32xf32>
    %c0_3 = arith.constant 0 : index
    %c0_4 = arith.constant 0 : index
    %3 = vector.load %arg3[%c0_3, %c0_4] : memref<1x32xf32, #tpu.memory_space<vmem>>, vector<1x32xf32>
    %4 = vector.broadcast %3 : vector<1x32xf32> to vector<8x32xf32>
    %5 = arith.addf %2, %4 : vector<8x32xf32>
    %cst_5 = arith.constant 0.000000e+00 : f32
    %6 = vector.broadcast %cst_5 : f32 to vector<8x32xf32>
    %7 = arith.maximumf %5, %6 : vector<8x32xf32>
    %c0_6 = arith.constant 0 : index
    %c0_7 = arith.constant 0 : index
    %8 = vector.load %arg4[%c0_6, %c0_7] : memref<32x128xf32, #tpu.memory_space<vmem>>, vector<32x128xf32>
    %cst_8 = arith.constant dense<0.000000e+00> : vector<8x128xf32>
    %9 = tpu.matmul %7, %8, %cst_8 {dimension_numbers = #tpu.dot_dimension_numbers<[1], [0], [0], [1], [0, 0, 1, 1], [], []>} : vector<8x32xf32>, vector<32x128xf32>, vector<8x128xf32> -> vector<8x128xf32>
    %c0_9 = arith.constant 0 : index
    %c0_10 = arith.constant 0 : index
    %10 = vector.load %arg5[%c0_9, %c0_10] : memref<1x128xf32, #tpu.memory_space<vmem>>, vector<1x128xf32>
    %11 = vector.broadcast %10 : vector<1x128xf32> to vector<8x128xf32>
    %12 = arith.addf %9, %11 : vector<8x128xf32>
    %c0_11 = arith.constant 0 : index
    %c0_12 = arith.constant 0 : index
    %13 = vector.load %arg6[%c0_11, %c0_12] : memref<8x128xf32, #tpu.memory_space<vmem>>, vector<8x128xf32>
    tpu.vector_store %arg6[%c0_11, %c0_12], %12 {strides = array<i32>} : memref<8x128xf32, #tpu.memory_space<vmem>>, vector<8x128xf32>,
    return
  }
  func.func @transform_0(%arg0: i32) -> (i32, i32) {
    %c0_i32 = arith.constant 0 : i32
    %c0_i32_0 = arith.constant 0 : i32
    return %arg0, %c0_i32 : i32, i32
  }
  func.func @transform_1(%arg0: i32) -> (i32, i32) {
    %c0_i32 = arith.constant 0 : i32
    %c0_i32_0 = arith.constant 0 : i32
    %c0_i32_1 = arith.constant 0 : i32
    return %c0_i32, %c0_i32_0 : i32, i32
  }
  func.func @transform_2(%arg0: i32) -> (i32, i32) {
    %c0_i32 = arith.constant 0 : i32
    %c0_i32_0 = arith.constant 0 : i32
    %c0_i32_1 = arith.constant 0 : i32
    return %c0_i32, %c0_i32_0 : i32, i32
  }
  func.func @transform_3(%arg0: i32) -> (i32, i32) {
    %c0_i32 = arith.constant 0 : i32
    %c0_i32_0 = arith.constant 0 : i32
    %c0_i32_1 = arith.constant 0 : i32
    return %c0_i32, %c0_i32_0 : i32, i32
  }
  func.func @transform_4(%arg0: i32) -> (i32, i32) {
    %c0_i32 = arith.constant 0 : i32
    %c0_i32_0 = arith.constant 0 : i32
    %c0_i32_1 = arith.constant 0 : i32
    return %c0_i32, %c0_i32_0 : i32, i32
  }
  func.func @transform_5(%arg0: i32) -> (i32, i32) {
    %c0_i32 = arith.constant 0 : i32
    %c0_i32_0 = arith.constant 0 : i32
    return %arg0, %c0_i32 : i32, i32
  }
}

</mosaic_0001>

<bundles_post_ra>
// kernel: tpu_custom_call.1
= control target key start
LH: loop header
LB: loop body
LE: loop exit
PB: predicated region body
PF: predicated region fallthrough
CT: control target
= control target key end

     0   :  { %10 = vsyncpa [#allocation3], 0  ;;  %s315_s0 = inlined_call_operand.hbm [shape: f32[8,16], index: 0, kind: input, shape index: {}]   ;;  %s316_s1 = inlined_call_operand.hbm [shape: f32[16,32], index: 1, kind: input, shape index: {}]   ;;  %s317_s2 = inlined_call_operand.vmem [shape: f32[1,32], index: 2, kind: input, shape index: {}]   ;;  %s318_s3 = inlined_call_operand.hbm [shape: f32[32,128], index: 3, kind: input, shape index: {}]   ;;  %s319_s4 = inlined_call_operand.vmem [shape: f32[1,128], index: 4, kind: input, shape index: {}]   ;;  %s320_s5 = inlined_call_operand.hbm [shape: f32[8,128], index: 5, kind: output, shape index: {}]  }
   0x1   :  { %11 = vsyncpa [#allocation6], 0  ;;  %s28_s20 = sshll.u32 %s316_s1, 4  ;;  %s29_s20 = int_to_ptr.hbm [resolvable:$true] %s28_s20 }
   0x2   :  { %12 = vsyncpa [#allocation4], 0  ;;  %s261_s21 = smov [#allocation5]   ;;  %s18_s25 = sshll.u32 %s315_s0, 4  ;;  %s19_s25 = int_to_ptr.hbm [resolvable:$true] %s18_s25 }
   0x3   :  { %s30_s22 = sshll.u32 %s261_s21, 4  ;;  %s262_s26 = smov 128   ;;  %s31_s22 = int_to_ptr.vmem [resolvable:$true] %s30_s22 }
   0x4   :  { %s263_s27 = smov 8   ;;  %s264_s28 = smov [#allocation2]  }
   0x5   :  { %36 = dma.hbm_to_vmem [thread:$0]  %s29_s20, 256, %s31_s22, [#allocation6], %s262_s26, %s262_s26, %s263_s27  }
   0x6   :  { %s20_s29 = sshll.u32 %s264_s28, 4  ;;  %s43_s7 = sshll.u32 %s318_s3, 4  ;;  %s21_s29 = int_to_ptr.vmem [resolvable:$true] %s20_s29  ;;  %s44_s7 = int_to_ptr.hbm [resolvable:$true] %s43_s7 }
   0x7   :  { %23 = dma.hbm_to_vmem [thread:$0]  %s19_s25, 128, %s21_s29, [#allocation3]  }
   0x8   :  { %s265_s1 = smov [#allocation7]  }
   0x9   :  { %s45_s8 = sshll.u32 %s265_s1, 4  ;;  %s46_s8 = int_to_ptr.vmem [resolvable:$true] %s45_s8 }
   0xa   :  { %51 = dma.hbm_to_vmem [thread:$0]  %s44_s7, 512, %s46_s8, [#allocation6], %s262_s26, %s262_s26, %s263_s27  }
   0xb   :  { %255 = dma.done.wait [#allocation3], 128  }
   0xc   :  { %256 = vsyncadd [#allocation3], 4294967168 }
   0xd   :  { %257 = dma.done.wait [#allocation6], 768  }
   0xe   :  { %258 = vsyncadd [#allocation6], 4294966528  ;;  %v68_v0 = vld [vmem:[#allocation5 + $0x8] sm:$0xff]  ;;  %v67_v1 = vld [vmem:[#allocation5] sm:$0xff]  ;;  %vm73_vm0 = vcmask 130048   ;;  %vm106_vm1 = vcmask 261120  }
   0xf   :  { %91 = vmatpush.msra.mxu0 %v68_v0  ;;  %v66_v2 = vld [vmem:[#allocation2] sm:$0xff]  ;;  %v101_v3 = vld [vmem:[#allocation7 + $0x18] sm:$0xff]  ;;  %v100_v4 = vld [vmem:[#allocation7 + $0x10] sm:$0xff]  ;;  %s266_s11 = smov [#allocation8]   ;;  %s138_s15 = sshll.u32 %s320_s5, 4  ;;  %s139_s15 = int_to_ptr.hbm [resolvable:$true] %s138_s15 }
  0x10   :  { %122 = vmatpush.msra.mxu1 %v101_v3  ;;  %v99_v5 = vld [vmem:[#allocation7 + $0x8] sm:$0xff]  ;;  %v98_v6 = vld [vmem:[#allocation7] sm:$0xff]  ;;  %s136_s12 = sshll.u32 %s266_s11, 4  ;;  %s137_s12 = int_to_ptr.vmem [resolvable:$true] %s136_s12 }
  0x11   :  { %92 = vmatpush.msra.mxu0 %v67_v1  ;;  %v157_v7 = vld [vmem:[%s317_s2] ss:$0 sm:$0xff] }
  0x12   :  { %149 = vmatmul.msk.f32.vlgmr.msra.gmra.mxu0 %vm73_vm0, %v66_v2  ;;  %123 = vmatpush.msra.mxu1 %v100_v4  ;;  %v158_v11 = vld [vmem:[%s319_s4] ss:$0 sm:$0xff] }
  0x14   :  { %124 = vmatpush.msra.mxu1 %v99_v5 }
  0x16   :  { %125 = vmatpush.msra.mxu1 %v98_v6 }
  0x8f   :  { %v94_v8 = vpop.f32.mrf.mxu0 }
  0x90   :  { %v95_v9 = vadd.f32 %v157_v7, %v94_v8 }
  0x92   :  { %v97_v10 = vmax.f32 %v95_v9, 0.0 }
  0x94   :  { %150 = vmatmul.msk.f32.vlgmr.msra.gmra.mxu1 %vm106_vm1, %v97_v10 }
 0x111   :  { %v127_v12 = vpop.f32.mrf.mxu1 }
 0x112   :  { %v128_v13 = vadd.f32 %v158_v11, %v127_v12 }
 0x114   :  { %130 = vst [vmem:[#allocation8] sm:$0xff] %v128_v13 }
 0x115   :  { %141 = dma.vmem_to_hbm [thread:$0]  %s137_s12, 128, %s139_s15, [#allocation4]  }
 0x116   :  { %259 = dma.done.wait [#allocation4], 128  }
 0x117   :  { %260 = vsyncadd [#allocation4], 4294967168 }
 0x118   :  { %146 = vsyncpa [#allocation3], 1 }
 0x119   :  { %147 = vsyncpa [#allocation6], 1 }
 0x11a   :  { %148 = vsyncpa [#allocation4], 1 }

</bundles_post_ra>
